<compile_context>
chip_gen: v6e
topology: v6e:2x2x1
jax: 0.10.0
libtpu: 0.0.40
codegen_flags: <defaults>
</compile_context>

<pallas_src>
import functools

import jax
import jax.numpy as jnp
from jax import lax
from jax.experimental import pallas as pl
from jax.experimental.pallas import tpu as pltpu

LANE = 128
MIN_ROWS = 8           # minimum sublane rows of a slab (f32 native tile)
TM_MAX = 4096          # max rows per block -> 2 MiB (f32) per input block
ACC_ROWS = 8           # (8, 128) partial-sum accumulator = one f32 vreg


def _sublane(dtype):
    """Native sublane tile height: 8 (f32) / 16 (bf16,f16) / 32 (int8,fp8)."""
    return max(MIN_ROWS, 32 // jnp.dtype(dtype).itemsize)


def _to_slab(a):
    """Flatten to a (rows, 128) lane-dense slab in the input's native dtype.

    Fast path (NO extra HBM copy): a.size % 128 == 0 and a.size >= 8*128 --
    then this is a metadata-only reshape. Otherwise only the small tail is
    padded, which materializes a padded copy of this tensor; prefer
    128-multiple element counts for large inputs.
    Returns (slab, n_valid_elements).
    """
    flat = jnp.ravel(a)
    n = flat.shape[0]
    rows = max(pl.cdiv(n, LANE), MIN_ROWS)
    total = rows * LANE
    if total != n:
        # TODO(synk): copy-free (prefix blocks + manually-DMA'd masked tail)
        # path for very large ragged inputs to avoid the jnp.pad HBM copy.
        flat = jnp.pad(flat, (0, total - n))
    return flat.reshape(rows, LANE), n


def _block_rows(rows, sub):
    """Largest multiple of `sub` <= min(rows, TM_MAX); never below 8."""
    tm = (min(rows, TM_MAX) // sub) * sub
    if tm < MIN_ROWS:
        tm = (min(rows, TM_MAX) // MIN_ROWS) * MIN_ROWS
    return max(tm, MIN_ROWS)


def _num_tensorcores():
    """2 TensorCores only on v7x-class chips; v5e/v6e are single-TC."""
    try:
        kind = jax.devices()[0].device_kind.lower()
    except Exception:
        return 1
    return 2 if ("v7" in kind or "tpu7" in kind) else 1


def _in_spec(tm, nblocks, nbpc):
    last = nblocks - 1
    return pl.BlockSpec(
        (tm, LANE), lambda c, i: (jnp.minimum(c * nbpc + i, last), 0))


def _make_kernel(cfg1, cfg2, cfgt, nbpc):
    """cfg = (tm, n_valid_elements, n_blocks) for each tensor pair."""

    def kernel(y1_ref, x1_ref, y2_ref, x2_ref, t1_ref, t2_ref,
               o1_ref, o2_ref, o3_ref, acc1, acc2, acc3):
        c = pl.program_id(0)
        i = pl.program_id(1)
        g = c * nbpc + i            # global row-block index for this step

        @pl.when(i == 0)
        def _zero():
            acc1[...] = jnp.zeros_like(acc1)
            acc2[...] = jnp.zeros_like(acc2)
            acc3[...] = jnp.zeros_like(acc3)

        def valid_mask(tm, n):
            # Row-based index math: stays well inside int32 even for very
            # large tensors (no g*tm*LANE element-index product).
            full_rows = n // LANE
            rem = n % LANE
            grow = g * tm + lax.broadcasted_iota(jnp.int32, (tm, LANE), 0)
            if rem == 0:
                return grow < full_rows
            col = lax.broadcasted_iota(jnp.int32, (tm, LANE), 1)
            return (grow < full_rows) | ((grow == full_rows) & (col < rem))

        def fold(acc, contrib, tm):
            # (tm,128) -> (tm//8, 8, 128) is exactly tile-aligned (no
            # relayout); the leading-axis sum is pure VPU vreg adds into the
            # small (8,128) partial-sum accumulator (no full-block RMW).
            acc[...] += jnp.sum(
                contrib.reshape(tm // ACC_ROWS, ACC_ROWS, LANE), axis=0)

        def guarded(cfg, add):
            tm, n, nb = cfg
            if nb * tm * LANE == n:          # no ragged tail at all
                @pl.when(g < nb)
                def _():
                    add(False)
            else:                            # mask only the final block
                @pl.when(g < nb - 1)
                def _():
                    add(False)

                @pl.when(g == nb - 1)
                def _():
                    add(True)

        def ce_accum(acc, y_ref, x_ref, cfg):
            tm, n, _ = cfg

            def add(masked):
                x = x_ref[...].astype(jnp.float32)
                y = y_ref[...].astype(jnp.float32)
                if masked:
                    v = valid_mask(tm, n)
                    # Mask x BEFORE the log so padding / uninitialized block
                    # tails never reach the transcendental: log(1)*0 == 0.
                    x = jnp.where(v, x, 1.0)
                    y = jnp.where(v, y, 0.0)
                fold(acc, jnp.log(x) * y, tm)

            guarded(cfg, add)

        def sse_accum(acc, a_ref, b_ref, cfg):
            tm, n, _ = cfg

            def add(masked):
                d = a_ref[...].astype(jnp.float32) - b_ref[...].astype(jnp.float32)
                if masked:
                    d = jnp.where(valid_mask(tm, n), d, 0.0)
                fold(acc, d * d, tm)

            guarded(cfg, add)

        ce_accum(acc1, y1_ref, x1_ref, cfg1)
        ce_accum(acc2, y2_ref, x2_ref, cfg2)
        sse_accum(acc3, t1_ref, t2_ref, cfgt)

        @pl.when(i == pl.num_programs(1) - 1)
        def _flush():
            # One small cross-lane reduce per accumulator, broadcast into the
            # lane-aligned (8, 128) output tile owned by this parallel slice.
            o1_ref[...] = jnp.full((ACC_ROWS, LANE), jnp.sum(acc1[...]),
                                   dtype=jnp.float32)
            o2_ref[...] = jnp.full((ACC_ROWS, LANE), jnp.sum(acc2[...]),
                                   dtype=jnp.float32)
            o3_ref[...] = jnp.full((ACC_ROWS, LANE), jnp.sum(acc3[...]),
                                   dtype=jnp.float32)

    return kernel


def _bl_loss_sums(y1, x1, y2, x2, t1, t2):
    """Returns (sum(log(x1)*y1), sum(log(x2)*y2), sum((t1-t2)^2)) as f32."""
    assert y1.shape == x1.shape and y2.shape == x2.shape and t1.shape == t2.shape

    y1s, n1 = _to_slab(y1)
    x1s, _ = _to_slab(x1)
    y2s, n2 = _to_slab(y2)
    x2s, _ = _to_slab(x2)
    t1s, nt = _to_slab(t1)
    t2s, _ = _to_slab(t2)

    r1, r2, rt = y1s.shape[0], y2s.shape[0], t1s.shape[0]
    sub1 = max(_sublane(y1.dtype), _sublane(x1.dtype))
    sub2 = max(_sublane(y2.dtype), _sublane(x2.dtype))
    subt = max(_sublane(t1.dtype), _sublane(t2.dtype))
    tm1 = _block_rows(r1, sub1)
    tm2 = _block_rows(r2, sub2)
    tmt = _block_rows(rt, subt)
    nb1, nb2, nbt = pl.cdiv(r1, tm1), pl.cdiv(r2, tm2), pl.cdiv(rt, tmt)

    nb_max = max(nb1, nb2, nbt)
    ncores = max(1, min(_num_tensorcores(), nb_max))   # 2 only on v7x
    nbpc = pl.cdiv(nb_max, ncores)                     # inner extent per core

    cfg1 = (tm1, n1, nb1)
    cfg2 = (tm2, n2, nb2)
    cfgt = (tmt, nt, nbt)

    out_spec = pl.BlockSpec((ACC_ROWS, LANE), lambda c, i: (c, 0))
    out_sds = jax.ShapeDtypeStruct((ncores * ACC_ROWS, LANE), jnp.float32)

    o1, o2, o3 = pl.pallas_call(
        _make_kernel(cfg1, cfg2, cfgt, nbpc),
        out_shape=(out_sds, out_sds, out_sds),
        grid_spec=pltpu.PrefetchScalarGridSpec(
            num_scalar_prefetch=0,
            grid=(ncores, nbpc),
            in_specs=[
                _in_spec(tm1, nb1, nbpc), _in_spec(tm1, nb1, nbpc),
                _in_spec(tm2, nb2, nbpc), _in_spec(tm2, nb2, nbpc),
                _in_spec(tmt, nbt, nbpc), _in_spec(tmt, nbt, nbpc),
            ],
            out_specs=[out_spec, out_spec, out_spec],
            scratch_shapes=[
                pltpu.VMEM((ACC_ROWS, LANE), jnp.float32),
                pltpu.VMEM((ACC_ROWS, LANE), jnp.float32),
                pltpu.VMEM((ACC_ROWS, LANE), jnp.float32),
            ],
        ),
        compiler_params=pltpu.CompilerParams(
            dimension_semantics=("parallel", "arbitrary"),
            # Explicit limit is required on v5e (16 MiB scoped default) and
            # keeps 6 double-buffered 2 MiB input blocks legal everywhere.
            vmem_limit_bytes=32 * 1024 * 1024,
        ),
    )(y1s, x1s, y2s, x2s, t1s, t2s)

    def corner_sum(o):
        return jnp.sum(o.reshape(ncores, ACC_ROWS, LANE)[:, 0, 0])

    return corner_sum(o1), corner_sum(o2), corner_sum(o3)


def bl_loss(y1, x1, y2, x2, t1, t2, lam=200.0):
    s_ce1, s_ce2, s_sse = _bl_loss_sums(y1, x1, y2, x2, t1, t2)
    S1 = x1.shape[2] * x1.shape[3]
    S2 = x2.shape[2] * x2.shape[3]
    ce1 = -s_ce1 / jnp.float32(S1)
    ce2 = -s_ce2 / jnp.float32(S2)
    mse = s_sse / jnp.float32(t1.size)
    return ce1 + ce2 + jnp.float32(lam) * mse


def _bl_loss_ref(y1, x1, y2, x2, t1, t2, lam=200.0):
    S1 = x1.shape[2] * x1.shape[3]
    S2 = x2.shape[2] * x2.shape[3]
    ce1 = -jnp.sum(jnp.log(x1) * y1) / S1
    ce2 = -jnp.sum(jnp.log(x2) * y2) / S2
    mse = jnp.mean((t1 - t2) ** 2)
    return ce1 + ce2 + lam * mse


if __name__ == "__main__":
    key = jax.random.PRNGKey(0)
    k1, k2, k3, k4, k5, k6 = jax.random.split(key, 6)

    B, C, H, W = 2, 4, 16, 16  # NCHW

    # probabilities / positive inputs for log()
    x1 = jax.random.uniform(k1, (B, C, H, W), jnp.float32, 0.1, 1.0)
    x2 = jax.random.uniform(k2, (B, C, H, W), jnp.float32, 0.1, 1.0)
    y1 = jax.random.uniform(k3, (B, C, H, W), jnp.float32, 0.0, 1.0)
    y2 = jax.random.uniform(k4, (B, C, H, W), jnp.float32, 0.0, 1.0)
    t1 = jax.random.normal(k5, (B, C, H, W), jnp.float32)
    t2 = jax.random.normal(k6, (B, C, H, W), jnp.float32)

    loss = jax.jit(functools.partial(bl_loss, lam=200.0))(y1, x1, y2, x2, t1, t2)
    loss = jax.block_until_ready(loss)

    ref = _bl_loss_ref(y1, x1, y2, x2, t1, t2, lam=200.0)
    assert jnp.allclose(loss, ref, rtol=1e-5, atol=1e-4), (loss, ref)

    print("KERNEL_OK")
</pallas_src>

<mosaic_0001>
module attributes {stable_mosaic.version = 11 : i64} {
  func.func @kernel(%arg0: i32, %arg1: i32, %arg2: memref<16x128xf32, #tpu.memory_space<vmem>>, %arg3: memref<16x128xf32, #tpu.memory_space<vmem>>, %arg4: memref<16x128xf32, #tpu.memory_space<vmem>>, %arg5: memref<16x128xf32, #tpu.memory_space<vmem>>, %arg6: memref<16x128xf32, #tpu.memory_space<vmem>>, %arg7: memref<16x128xf32, #tpu.memory_space<vmem>>, %arg8: memref<8x128xf32, #tpu.memory_space<vmem>>, %arg9: memref<8x128xf32, #tpu.memory_space<vmem>>, %arg10: memref<8x128xf32, #tpu.memory_space<vmem>>, %arg11: memref<8x128xf32, #tpu.memory_space<vmem>>, %arg12: memref<8x128xf32, #tpu.memory_space<vmem>>, %arg13: memref<8x128xf32, #tpu.memory_space<vmem>>) attributes {dimension_semantics = [#tpu.dimension_semantics<parallel>, #tpu.dimension_semantics<arbitrary>], iteration_bounds = array<i64: 1, 1>, scalar_prefetch = 0 : i64, scratch_operands = 3 : i64, tpu.core_type = #tpu.core_type<tc>, window_params = [{transform_indices = @transform_0, window_bounds = array<i64: 16, 128>}, {transform_indices = @transform_1, window_bounds = array<i64: 16, 128>}, {transform_indices = @transform_2, window_bounds = array<i64: 16, 128>}, {transform_indices = @transform_3, window_bounds = array<i64: 16, 128>}, {transform_indices = @transform_4, window_bounds = array<i64: 16, 128>}, {transform_indices = @transform_5, window_bounds = array<i64: 16, 128>}, {transform_indices = @transform_6, window_bounds = array<i64: 8, 128>}, {transform_indices = @transform_7, window_bounds = array<i64: 8, 128>}, {transform_indices = @transform_8, window_bounds = array<i64: 8, 128>}]} {
    %c1_i32 = arith.constant 1 : i32
    %0 = arith.muli %arg0, %c1_i32 : i32
    %1 = arith.addi %0, %arg1 : i32
    %c0_i32 = arith.constant 0 : i32
    %2 = arith.cmpi eq, %arg1, %c0_i32 : i32
    %3 = arith.extui %2 : i1 to i32
    %c0_i32_0 = arith.constant 0 : i32
    %4 = arith.cmpi ne, %3, %c0_i32_0 : i32
    scf.if %4 {
      %cst = arith.constant 0.000000e+00 : f32
      %17 = vector.broadcast %cst : f32 to vector<8x128xf32>
      %c0 = arith.constant 0 : index
      %c0_9 = arith.constant 0 : index
      %18 = vector.load %arg11[%c0, %c0_9] : memref<8x128xf32, #tpu.memory_space<vmem>>, vector<8x128xf32>
      tpu.vector_store %arg11[%c0, %c0_9], %17 {strides = array<i32>} : memref<8x128xf32, #tpu.memory_space<vmem>>, vector<8x128xf32>,
      %cst_10 = arith.constant 0.000000e+00 : f32
      %19 = vector.broadcast %cst_10 : f32 to vector<8x128xf32>
      %c0_11 = arith.constant 0 : index
      %c0_12 = arith.constant 0 : index
      %20 = vector.load %arg12[%c0_11, %c0_12] : memref<8x128xf32, #tpu.memory_space<vmem>>, vector<8x128xf32>
      tpu.vector_store %arg12[%c0_11, %c0_12], %19 {strides = array<i32>} : memref<8x128xf32, #tpu.memory_space<vmem>>, vector<8x128xf32>,
      %cst_13 = arith.constant 0.000000e+00 : f32
      %21 = vector.broadcast %cst_13 : f32 to vector<8x128xf32>
      %c0_14 = arith.constant 0 : index
      %c0_15 = arith.constant 0 : index
      %22 = vector.load %arg13[%c0_14, %c0_15] : memref<8x128xf32, #tpu.memory_space<vmem>>, vector<8x128xf32>
      tpu.vector_store %arg13[%c0_14, %c0_15], %21 {strides = array<i32>} : memref<8x128xf32, #tpu.memory_space<vmem>>, vector<8x128xf32>,
    } else {
    }
    %c1_i32_1 = arith.constant 1 : i32
    %5 = arith.cmpi slt, %1, %c1_i32_1 : i32
    %6 = arith.extui %5 : i1 to i32
    %c0_i32_2 = arith.constant 0 : i32
    %7 = arith.cmpi ne, %6, %c0_i32_2 : i32
    scf.if %7 {
      %c0 = arith.constant 0 : index
      %c0_9 = arith.constant 0 : index
      %17 = vector.load %arg3[%c0, %c0_9] : memref<16x128xf32, #tpu.memory_space<vmem>>, vector<16x128xf32>
      %c0_10 = arith.constant 0 : index
      %c0_11 = arith.constant 0 : index
      %18 = vector.load %arg2[%c0_10, %c0_11] : memref<16x128xf32, #tpu.memory_space<vmem>>, vector<16x128xf32>
      %19 = math.log %17 : vector<16x128xf32>
      %20 = arith.mulf %19, %18 : vector<16x128xf32>
      %c0_12 = arith.constant 0 : index
      %c0_13 = arith.constant 0 : index
      %21 = vector.load %arg11[%c0_12, %c0_13] : memref<8x128xf32, #tpu.memory_space<vmem>>, vector<8x128xf32>
      %22 = vector.shape_cast %20 : vector<16x128xf32> to vector<2x8x128xf32>
      %cst = arith.constant dense<0.000000e+00> : vector<8x128xf32>
      %23 = vector.multi_reduction <add>, %22, %cst [0] : vector<2x8x128xf32> to vector<8x128xf32>
      %24 = arith.addf %21, %23 : vector<8x128xf32>
      %c0_14 = arith.constant 0 : index
      %c0_15 = arith.constant 0 : index
      %25 = vector.load %arg11[%c0_14, %c0_15] : memref<8x128xf32, #tpu.memory_space<vmem>>, vector<8x128xf32>
      tpu.vector_store %arg11[%c0_14, %c0_15], %24 {strides = array<i32>} : memref<8x128xf32, #tpu.memory_space<vmem>>, vector<8x128xf32>,
    } else {
    }
    %c1_i32_3 = arith.constant 1 : i32
    %8 = arith.cmpi slt, %1, %c1_i32_3 : i32
    %9 = arith.extui %8 : i1 to i32
    %c0_i32_4 = arith.constant 0 : i32
    %10 = arith.cmpi ne, %9, %c0_i32_4 : i32
    scf.if %10 {
      %c0 = arith.constant 0 : index
      %c0_9 = arith.constant 0 : index
      %17 = vector.load %arg5[%c0, %c0_9] : memref<16x128xf32, #tpu.memory_space<vmem>>, vector<16x128xf32>
      %c0_10 = arith.constant 0 : index
      %c0_11 = arith.constant 0 : index
      %18 = vector.load %arg4[%c0_10, %c0_11] : memref<16x128xf32, #tpu.memory_space<vmem>>, vector<16x128xf32>
      %19 = math.log %17 : vector<16x128xf32>
      %20 = arith.mulf %19, %18 : vector<16x128xf32>
      %c0_12 = arith.constant 0 : index
      %c0_13 = arith.constant 0 : index
      %21 = vector.load %arg12[%c0_12, %c0_13] : memref<8x128xf32, #tpu.memory_space<vmem>>, vector<8x128xf32>
      %22 = vector.shape_cast %20 : vector<16x128xf32> to vector<2x8x128xf32>
      %cst = arith.constant dense<0.000000e+00> : vector<8x128xf32>
      %23 = vector.multi_reduction <add>, %22, %cst [0] : vector<2x8x128xf32> to vector<8x128xf32>
      %24 = arith.addf %21, %23 : vector<8x128xf32>
      %c0_14 = arith.constant 0 : index
      %c0_15 = arith.constant 0 : index
      %25 = vector.load %arg12[%c0_14, %c0_15] : memref<8x128xf32, #tpu.memory_space<vmem>>, vector<8x128xf32>
      tpu.vector_store %arg12[%c0_14, %c0_15], %24 {strides = array<i32>} : memref<8x128xf32, #tpu.memory_space<vmem>>, vector<8x128xf32>,
    } else {
    }
    %c1_i32_5 = arith.constant 1 : i32
    %11 = arith.cmpi slt, %1, %c1_i32_5 : i32
    %12 = arith.extui %11 : i1 to i32
    %c0_i32_6 = arith.constant 0 : i32
    %13 = arith.cmpi ne, %12, %c0_i32_6 : i32
    scf.if %13 {
      %c0 = arith.constant 0 : index
      %c0_9 = arith.constant 0 : index
      %17 = vector.load %arg6[%c0, %c0_9] : memref<16x128xf32, #tpu.memory_space<vmem>>, vector<16x128xf32>
      %c0_10 = arith.constant 0 : index
      %c0_11 = arith.constant 0 : index
      %18 = vector.load %arg7[%c0_10, %c0_11] : memref<16x128xf32, #tpu.memory_space<vmem>>, vector<16x128xf32>
      %19 = arith.subf %17, %18 : vector<16x128xf32>
      %20 = arith.mulf %19, %19 : vector<16x128xf32>
      %c0_12 = arith.constant 0 : index
      %c0_13 = arith.constant 0 : index
      %21 = vector.load %arg13[%c0_12, %c0_13] : memref<8x128xf32, #tpu.memory_space<vmem>>, vector<8x128xf32>
      %22 = vector.shape_cast %20 : vector<16x128xf32> to vector<2x8x128xf32>
      %cst = arith.constant dense<0.000000e+00> : vector<8x128xf32>
      %23 = vector.multi_reduction <add>, %22, %cst [0] : vector<2x8x128xf32> to vector<8x128xf32>
      %24 = arith.addf %21, %23 : vector<8x128xf32>
      %c0_14 = arith.constant 0 : index
      %c0_15 = arith.constant 0 : index
      %25 = vector.load %arg13[%c0_14, %c0_15] : memref<8x128xf32, #tpu.memory_space<vmem>>, vector<8x128xf32>
      tpu.vector_store %arg13[%c0_14, %c0_15], %24 {strides = array<i32>} : memref<8x128xf32, #tpu.memory_space<vmem>>, vector<8x128xf32>,
    } else {
    }
    %c0_i32_7 = arith.constant 0 : i32
    %14 = arith.cmpi eq, %arg1, %c0_i32_7 : i32
    %15 = arith.extui %14 : i1 to i32
    %c0_i32_8 = arith.constant 0 : i32
    %16 = arith.cmpi ne, %15, %c0_i32_8 : i32
    scf.if %16 {
      %c0 = arith.constant 0 : index
      %c0_9 = arith.constant 0 : index
      %17 = vector.load %arg11[%c0, %c0_9] : memref<8x128xf32, #tpu.memory_space<vmem>>, vector<8x128xf32>
      %18 = vector.shape_cast %17 : vector<8x128xf32> to vector<1x8x128xf32>
      %cst = arith.constant dense<0.000000e+00> : vector<1xf32>
      %19 = vector.multi_reduction <add>, %18, %cst [1, 2] : vector<1x8x128xf32> to vector<1xf32>
      %20 = vector.shape_cast %19 : vector<1xf32> to vector<1x1x1xf32>
      %21 = vector.extract %20[0, 0, 0] : f32 from vector<1x1x1xf32>
      %22 = vector.broadcast %21 : f32 to vector<8x128xf32>
      %c0_10 = arith.constant 0 : index
      %c0_11 = arith.constant 0 : index
      %23 = vector.load %arg8[%c0_10, %c0_11] : memref<8x128xf32, #tpu.memory_space<vmem>>, vector<8x128xf32>
      tpu.vector_store %arg8[%c0_10, %c0_11], %22 {strides = array<i32>} : memref<8x128xf32, #tpu.memory_space<vmem>>, vector<8x128xf32>,
      %c0_12 = arith.constant 0 : index
      %c0_13 = arith.constant 0 : index
      %24 = vector.load %arg12[%c0_12, %c0_13] : memref<8x128xf32, #tpu.memory_space<vmem>>, vector<8x128xf32>
      %25 = vector.shape_cast %24 : vector<8x128xf32> to vector<1x8x128xf32>
      %cst_14 = arith.constant dense<0.000000e+00> : vector<1xf32>
      %26 = vector.multi_reduction <add>, %25, %cst_14 [1, 2] : vector<1x8x128xf32> to vector<1xf32>
      %27 = vector.shape_cast %26 : vector<1xf32> to vector<1x1x1xf32>
      %28 = vector.extract %27[0, 0, 0] : f32 from vector<1x1x1xf32>
      %29 = vector.broadcast %28 : f32 to vector<8x128xf32>
      %c0_15 = arith.constant 0 : index
      %c0_16 = arith.constant 0 : index
      %30 = vector.load %arg9[%c0_15, %c0_16] : memref<8x128xf32, #tpu.memory_space<vmem>>, vector<8x128xf32>
      tpu.vector_store %arg9[%c0_15, %c0_16], %29 {strides = array<i32>} : memref<8x128xf32, #tpu.memory_space<vmem>>, vector<8x128xf32>,
      %c0_17 = arith.constant 0 : index
      %c0_18 = arith.constant 0 : index
      %31 = vector.load %arg13[%c0_17, %c0_18] : memref<8x128xf32, #tpu.memory_space<vmem>>, vector<8x128xf32>
      %32 = vector.shape_cast %31 : vector<8x128xf32> to vector<1x8x128xf32>
      %cst_19 = arith.constant dense<0.000000e+00> : vector<1xf32>
      %33 = vector.multi_reduction <add>, %32, %cst_19 [1, 2] : vector<1x8x128xf32> to vector<1xf32>
      %34 = vector.shape_cast %33 : vector<1xf32> to vector<1x1x1xf32>
      %35 = vector.extract %34[0, 0, 0] : f32 from vector<1x1x1xf32>
      %36 = vector.broadcast %35 : f32 to vector<8x128xf32>
      %c0_20 = arith.constant 0 : index
      %c0_21 = arith.constant 0 : index
      %37 = vector.load %arg10[%c0_20, %c0_21] : memref<8x128xf32, #tpu.memory_space<vmem>>, vector<8x128xf32>
      tpu.vector_store %arg10[%c0_20, %c0_21], %36 {strides = array<i32>} : memref<8x128xf32, #tpu.memory_space<vmem>>, vector<8x128xf32>,
    } else {
    }
    return
  }
  func.func @transform_0(%arg0: i32, %arg1: i32) -> (i32, i32) {
    %c1_i32 = arith.constant 1 : i32
    %0 = arith.muli %arg0, %c1_i32 : i32
    %1 = arith.addi %0, %arg1 : i32
    %c0_i32 = arith.constant 0 : i32
    %2 = arith.minsi %1, %c0_i32 : i32
    %c0_i32_0 = arith.constant 0 : i32
    %c0_i32_1 = arith.constant 0 : i32
    return %2, %c0_i32_0 : i32, i32
  }
  func.func @transform_1(%arg0: i32, %arg1: i32) -> (i32, i32) {
    %c1_i32 = arith.constant 1 : i32
    %0 = arith.muli %arg0, %c1_i32 : i32
    %1 = arith.addi %0, %arg1 : i32
    %c0_i32 = arith.constant 0 : i32
    %2 = arith.minsi %1, %c0_i32 : i32
    %c0_i32_0 = arith.constant 0 : i32
    %c0_i32_1 = arith.constant 0 : i32
    return %2, %c0_i32_0 : i32, i32
  }
  func.func @transform_2(%arg0: i32, %arg1: i32) -> (i32, i32) {
    %c1_i32 = arith.constant 1 : i32
    %0 = arith.muli %arg0, %c1_i32 : i32
    %1 = arith.addi %0, %arg1 : i32
    %c0_i32 = arith.constant 0 : i32
    %2 = arith.minsi %1, %c0_i32 : i32
    %c0_i32_0 = arith.constant 0 : i32
    %c0_i32_1 = arith.constant 0 : i32
    return %2, %c0_i32_0 : i32, i32
  }
  func.func @transform_3(%arg0: i32, %arg1: i32) -> (i32, i32) {
    %c1_i32 = arith.constant 1 : i32
    %0 = arith.muli %arg0, %c1_i32 : i32
    %1 = arith.addi %0, %arg1 : i32
    %c0_i32 = arith.constant 0 : i32
    %2 = arith.minsi %1, %c0_i32 : i32
    %c0_i32_0 = arith.constant 0 : i32
    %c0_i32_1 = arith.constant 0 : i32
    return %2, %c0_i32_0 : i32, i32
  }
  func.func @transform_4(%arg0: i32, %arg1: i32) -> (i32, i32) {
    %c1_i32 = arith.constant 1 : i32
    %0 = arith.muli %arg0, %c1_i32 : i32
    %1 = arith.addi %0, %arg1 : i32
    %c0_i32 = arith.constant 0 : i32
    %2 = arith.minsi %1, %c0_i32 : i32
    %c0_i32_0 = arith.constant 0 : i32
    %c0_i32_1 = arith.constant 0 : i32
    return %2, %c0_i32_0 : i32, i32
  }
  func.func @transform_5(%arg0: i32, %arg1: i32) -> (i32, i32) {
    %c1_i32 = arith.constant 1 : i32
    %0 = arith.muli %arg0, %c1_i32 : i32
    %1 = arith.addi %0, %arg1 : i32
    %c0_i32 = arith.constant 0 : i32
    %2 = arith.minsi %1, %c0_i32 : i32
    %c0_i32_0 = arith.constant 0 : i32
    %c0_i32_1 = arith.constant 0 : i32
    return %2, %c0_i32_0 : i32, i32
  }
  func.func @transform_6(%arg0: i32, %arg1: i32) -> (i32, i32) {
    %c0_i32 = arith.constant 0 : i32
    %c0_i32_0 = arith.constant 0 : i32
    return %arg0, %c0_i32 : i32, i32
  }
  func.func @transform_7(%arg0: i32, %arg1: i32) -> (i32, i32) {
    %c0_i32 = arith.constant 0 : i32
    %c0_i32_0 = arith.constant 0 : i32
    return %arg0, %c0_i32 : i32, i32
  }
  func.func @transform_8(%arg0: i32, %arg1: i32) -> (i32, i32) {
    %c0_i32 = arith.constant 0 : i32
    %c0_i32_0 = arith.constant 0 : i32
    return %arg0, %c0_i32 : i32, i32
  }
}

</mosaic_0001>

<bundles_post_ra>
// kernel: bl_loss.1
= control target key start
LH: loop header
LB: loop body
LE: loop exit
PB: predicated region body
PF: predicated region fallthrough
CT: control target
= control target key end

     0   :  { %s461_s4 = inlined_call_operand.vmem [shape: f32[16,128], index: 4, kind: input, shape index: {}]   ;;  %s462_s5 = inlined_call_operand.vmem [shape: f32[16,128], index: 5, kind: input, shape index: {}]   ;;  %s463_s1 = inlined_call_operand.vmem [shape: f32[16,128], index: 1, kind: input, shape index: {}]   ;;  %s464_s3 = inlined_call_operand.vmem [shape: f32[16,128], index: 3, kind: input, shape index: {}]   ;;  %s465_s0 = inlined_call_operand.vmem [shape: f32[16,128], index: 0, kind: input, shape index: {}]   ;;  %s466_s2 = inlined_call_operand.vmem [shape: f32[16,128], index: 2, kind: input, shape index: {}]   ;;  %s467_s6 = inlined_call_operand.vmem [shape: f32[8,128], index: 6, kind: output, shape index: {0}]   ;;  %s468_s7 = inlined_call_operand.vmem [shape: f32[8,128], index: 7, kind: output, shape index: {1}]   ;;  %s469_s8 = inlined_call_operand.vmem [shape: f32[8,128], index: 8, kind: output, shape index: {2}]  }
   0x1   :  { %v258_v0 = vld [vmem:[%s461_s4] sm:$0xff]  ;;  %v259_v1 = vld [vmem:[%s461_s4 + $0x8] sm:$0xff] }
   0x2   :  { %v260_v2 = vld [vmem:[%s462_s5] sm:$0xff]  ;;  %v261_v3 = vld [vmem:[%s462_s5 + $0x8] sm:$0xff] }
   0x3   :  { %v262_v4 = vsub.f32 %v258_v0, %v260_v2  ;;  %v230_v5 = vld [vmem:[%s463_s1] sm:$0xff]  ;;  %v231_v6 = vld [vmem:[%s463_s1 + $0x8] sm:$0xff]  ;;  %v263_v7 = vsub.f32 %v259_v1, %v261_v3 }
   0x4   :  { %363 = vlog2.f32 %v230_v5  ;;  %v244_v8 = vld [vmem:[%s464_s3] sm:$0xff]  ;;  %v245_v10 = vld [vmem:[%s464_s3 + $0x8] sm:$0xff] }
   0x5   :  { %v264_v9 = vmul.f32 %v262_v4, %v262_v4  ;;  %365 = vlog2.f32 %v231_v6  ;;  %v265_v11 = vmul.f32 %v263_v7, %v263_v7  ;;  %v232_v14 = vld [vmem:[%s465_s0] sm:$0xff]  ;;  %v233_v16 = vld [vmem:[%s465_s0 + $0x8] sm:$0xff] }
   0x6   :  { %367 = vlog2.f32 %v244_v8  ;;  %v246_v20 = vld [vmem:[%s466_s2] sm:$0xff]  ;;  %v247_v23 = vld [vmem:[%s466_s2 + $0x8] sm:$0xff] }
   0x7   :  { %369 = vlog2.f32 %v245_v10  ;;  %v267_v12 = vadd.f32 %v265_v11, %v264_v9 }
   0x9   :  { %298 = vadd.xlane.f32.xlu1 %v267_v12 }
  0x11   :  { %v364_v13 = vpop.eup %363 }
  0x12   :  { %v366_v15 = vpop.eup %365  ;;  %v235_v17 = vmul.f32 0.6931472, %v364_v13 }
  0x13   :  { %v368_v18 = vpop.eup %367  ;;  %v237_v19 = vmul.f32 0.6931472, %v366_v15 }
  0x14   :  { %v370_v21 = vpop.eup %369  ;;  %v238_v22 = vmul.f32 %v235_v17, %v232_v14  ;;  %v249_v24 = vmul.f32 0.6931472, %v368_v18 }
  0x15   :  { %v239_v25 = vmul.f32 %v237_v19, %v233_v16  ;;  %v251_v26 = vmul.f32 0.6931472, %v370_v21 }
  0x16   :  { %v252_v27 = vmul.f32 %v249_v24, %v246_v20 }
  0x17   :  { %v241_v28 = vadd.f32 %v239_v25, %v238_v22  ;;  %v253_v29 = vmul.f32 %v251_v26, %v247_v23 }
  0x19   :  { %274 = vadd.xlane.f32.xlu0 %v241_v28  ;;  %v255_v30 = vadd.f32 %v253_v29, %v252_v27 }
  0x1d   :  { %286 = vadd.xlane.f32.xlu0 %v255_v30 }
  0x92   :  { %v299_v31 = vpop.xlane.xlu1 %298 }
  0x93   :  { %v300_v32 = vrot.slane %v299_v31, 4 }
  0x95   :  { %v301_v33 = vadd.f32 %v300_v32, %v299_v31 }
  0x97   :  { %v302_v37 = vrot.slane %v301_v33, 2 }
  0x99   :  { %v303_v43 = vadd.f32 %v302_v37, %v301_v33 }
  0x9b   :  { %v304_v48 = vrot.slane %v303_v43, 1 }
  0x9d   :  { %v305_v51 = vadd.f32 %v304_v48, %v303_v43 }
  0xa2   :  { %v275_v34 = vpop.xlane.xlu0 %274 }
  0xa3   :  { %v276_v35 = vrot.slane %v275_v34, 4 }
  0xa5   :  { %v277_v36 = vadd.f32 %v276_v35, %v275_v34 }
  0xa6   :  { %v287_v38 = vpop.xlane.xlu0 %286 }
  0xa7   :  { %v278_v39 = vrot.slane %v277_v36, 2  ;;  %v288_v40 = vrot.slane %v287_v38, 4 }
  0xa9   :  { %v289_v41 = vadd.f32 %v288_v40, %v287_v38  ;;  %v279_v42 = vadd.f32 %v278_v39, %v277_v36 }
  0xab   :  { %v290_v44 = vrot.slane %v289_v41, 2  ;;  %v280_v45 = vrot.slane %v279_v42, 1 }
  0xad   :  { %v291_v46 = vadd.f32 %v290_v44, %v289_v41  ;;  %v281_v47 = vadd.f32 %v280_v45, %v279_v42 }
  0xaf   :  { %357 = vpush %v281_v47  ;;  %v292_v49 = vrot.slane %v291_v46, 1 }
  0xb1   :  { %v293_v50 = vadd.f32 %v292_v49, %v291_v46 }
  0xb3   :  { %359 = vpush %v293_v50 }
  0xb4   :  { %361 = vpush %v305_v51 }
  0xe0   :  { %s358_s0 = spop %357 }
  0xe1   :  { %v283_v52 = vstv %s358_s0 }
  0xe2   :  { %284 = vst [vmem:[%s467_s6] sm:$0xff] %v283_v52 }
  0xe4   :  { %s360_s26 = spop %359 }
  0xe5   :  { %v295_v53 = vstv %s360_s26  ;;  %s362_s27 = spop %361 }
  0xe6   :  { %296 = vst [vmem:[%s468_s7] sm:$0xff] %v295_v53  ;;  %v307_v54 = vstv %s362_s27 }
  0xe7   :  { %308 = vst [vmem:[%s469_s8] sm:$0xff] %v307_v54 }

</bundles_post_ra>
